<compile_context>
chip_gen: v6e
topology: v6e:2x2x1
jax: 0.10.0
libtpu: 0.0.40
codegen_flags: <defaults>
</compile_context>

<pallas_src>
import numpy as np
import jax
import jax.numpy as jnp
from jax.experimental import pallas as pl
from jax.experimental.pallas import tpu as pltpu


# ----------------------------------------------------------------------------
# Deterministic parameter init (mirrors layer_init: orthogonal weight * std,
# constant bias). Exact bit-match to torch is not required, only determinism.
# ----------------------------------------------------------------------------
def orthogonal_init(key, out_features, in_features, std):
    init = jax.nn.initializers.orthogonal(scale=std)
    return init(key, (out_features, in_features), jnp.float32)


def make_params(seed=0):
    """f32 master parameters, stored transposed as [in, out]."""
    key = jax.random.PRNGKey(seed)
    ks = jax.random.split(key, 5)
    std = float(np.sqrt(2.0))
    p = {}
    p["w1"] = orthogonal_init(ks[0], 64, 53, std).T          # [53, 64]
    p["b1"] = jnp.zeros((1, 64), jnp.float32)
    p["w2"] = orthogonal_init(ks[1], 128, 64, std).T         # [64, 128]
    p["b2"] = jnp.zeros((1, 128), jnp.float32)
    p["w3"] = orthogonal_init(ks[2], 256, 128, std).T        # [128, 256]
    p["b3"] = jnp.zeros((1, 256), jnp.float32)
    p["wa"] = orthogonal_init(ks[3], 78, 256, 0.01).T        # [256, 78]
    p["ba"] = jnp.zeros((1, 78), jnp.float32)
    p["wc"] = orthogonal_init(ks[4], 1, 256, 1.0).T          # [256, 1]
    p["bc"] = jnp.zeros((1, 1), jnp.float32)
    return p


def pack_kernel_params(p):
    """Pad ragged dims, fuse actor/critic heads, cast weights to bf16."""
    # layer 1: input padded 53 -> 64 (rows 53..63 zero), output padded 64 -> 128
    w1 = jnp.zeros((64, 128), jnp.float32).at[:53, :64].set(p["w1"])
    b1 = jnp.zeros((1, 128), jnp.float32).at[:, :64].set(p["b1"])
    # layer 2: input padded 64 -> 128 (rows 64..127 zero)
    w2 = jnp.zeros((128, 128), jnp.float32).at[:64, :].set(p["w2"])
    b2 = p["b2"]
    w3 = p["w3"]
    b3 = p["b3"]
    # fused head: cols 0..77 actor, col 78 critic, cols 79..127 zero padding
    wh = (jnp.zeros((256, 128), jnp.float32)
          .at[:, :78].set(p["wa"])
          .at[:, 78:79].set(p["wc"]))
    bh = (jnp.zeros((1, 128), jnp.float32)
          .at[:, :78].set(p["ba"])
          .at[:, 78:79].set(p["bc"]))
    bf16 = jnp.bfloat16
    return {
        "w1": w1.astype(bf16), "b1": b1,
        "w2": w2.astype(bf16), "b2": b2,
        "w3": w3.astype(bf16), "b3": b3,
        "wh": wh.astype(bf16), "bh": bh,
    }


# ----------------------------------------------------------------------------
# Pallas kernel: whole MLP hot path (3 matmul+ReLU, 1 fused head matmul)
# ----------------------------------------------------------------------------
def gnn_kernel(x_ref, w1_ref, b1_ref, w2_ref, b2_ref, w3_ref, b3_ref,
               wh_ref, bh_ref, out_ref, xpad_ref):
    # Zero-pad the 53-wide input tile to 64 lanes in a VMEM scratch.
    # (Unconditional zero fill: cheap vs. the matmuls, and keeps the pad
    # columns well-defined on every core of a megacore split.)
    xpad_ref[...] = jnp.zeros_like(xpad_ref)
    xpad_ref[:, :53] = x_ref[...]                             # f32 [TB, 53]
    x = xpad_ref[...].astype(jnp.bfloat16)                    # bf16 [TB, 64]

    h1 = jnp.dot(x, w1_ref[...], preferred_element_type=jnp.float32)
    h1 = jnp.maximum(h1 + b1_ref[...], 0.0)                   # f32 [TB, 128]

    h2 = jnp.dot(h1.astype(jnp.bfloat16), w2_ref[...],
                 preferred_element_type=jnp.float32)
    h2 = jnp.maximum(h2 + b2_ref[...], 0.0)                   # f32 [TB, 128]

    obs = jnp.dot(h2.astype(jnp.bfloat16), w3_ref[...],
                  preferred_element_type=jnp.float32)
    obs = jnp.maximum(obs + b3_ref[...], 0.0)                 # f32 [TB, 256]

    head = jnp.dot(obs.astype(jnp.bfloat16), wh_ref[...],
                   preferred_element_type=jnp.float32) + bh_ref[...]
    out_ref[...] = head.astype(out_ref.dtype)                 # bf16 [TB, 128]


def _round_up(n, m):
    return ((n + m - 1) // m) * m


def _pick_tile(B):
    # Large tiles amortize the ~0.35 us per-grid-step overhead; cap at 1024
    # rows (still only a few MiB of VMEM).  Split the batch at least two ways
    # when possible so a v7x megacore keeps both TensorCores busy.
    TB = min(1024, _round_up(pl.cdiv(B, 2), 8))
    return max(TB, 8)


def gnn_forward_fused(x, kp):
    """x: [B, 53] f32 -> fused head output [B, 128] bf16
    (cols 0..77 actor logits, col 78 critic value, cols 79..127 zero pad)."""
    B = x.shape[0]
    TB = _pick_tile(B)
    grid = (pl.cdiv(B, TB),)

    args = (x,
            kp["w1"], kp["b1"], kp["w2"], kp["b2"],
            kp["w3"], kp["b3"], kp["wh"], kp["bh"])

    # VMEM budget: every input/output BlockSpec is double-buffered (weights
    # and biases included), plus the xpad scratch and f32/bf16 intermediates.
    weight_bytes = sum(int(np.prod(a.shape)) * a.dtype.itemsize
                       for a in args[1:])
    io_bytes = 2 * (weight_bytes + TB * 53 * 4 + TB * 128 * 2)
    scratch_bytes = TB * 64 * 4
    act_bytes = TB * (128 + 128 + 256) * (4 + 2)       # f32 acts + bf16 casts
    vmem_limit = max(32 << 20, 2 * (io_bytes + scratch_bytes + act_bytes))

    # Batch-tiled specs for x/out; weights/biases constant (VMEM-resident).
    # x's last block dim (53) equals the full array dim, so it is legal and
    # the raw f32 input needs no wrapper-side pad/cast pass.
    in_specs = [
        pl.BlockSpec((TB, 53), lambda i: (i, 0)),      # x (raw, f32)
        pl.BlockSpec((64, 128), lambda i: (0, 0)),     # w1
        pl.BlockSpec((1, 128), lambda i: (0, 0)),      # b1
        pl.BlockSpec((128, 128), lambda i: (0, 0)),    # w2
        pl.BlockSpec((1, 128), lambda i: (0, 0)),      # b2
        pl.BlockSpec((128, 256), lambda i: (0, 0)),    # w3
        pl.BlockSpec((1, 256), lambda i: (0, 0)),      # b3
        pl.BlockSpec((256, 128), lambda i: (0, 0)),    # wh (fused heads)
        pl.BlockSpec((1, 128), lambda i: (0, 0)),      # bh
    ]
    out_spec = pl.BlockSpec((TB, 128), lambda i: (i, 0))
    out_shape = jax.ShapeDtypeStruct((B, 128), jnp.bfloat16)

    return pl.pallas_call(
        gnn_kernel,
        grid=grid,
        in_specs=in_specs,
        out_specs=out_spec,
        out_shape=out_shape,
        scratch_shapes=[pltpu.VMEM((TB, 64), jnp.float32)],
        compiler_params=pltpu.CompilerParams(
            dimension_semantics=("parallel",),
            vmem_limit_bytes=int(vmem_limit)),
    )(*args)


def gnn_forward(x, kp):
    """Convenience wrapper: x [B,53] f32 -> (actor [B,78] f32, critic [B,1] f32).
    Bandwidth-sensitive callers should consume gnn_forward_fused directly."""
    fused = gnn_forward_fused(x, kp)
    actor = fused[:, :78].astype(jnp.float32)
    critic = fused[:, 78:79].astype(jnp.float32)
    return actor, critic


# Pure-JAX f32 reference (unpadded, unfused) for a sanity check
def gnn_forward_ref(x, p):
    h = jnp.maximum(x @ p["w1"] + p["b1"], 0.0)
    h = jnp.maximum(h @ p["w2"] + p["b2"], 0.0)
    obs = jnp.maximum(h @ p["w3"] + p["b3"], 0.0)
    return obs @ p["wa"] + p["ba"], obs @ p["wc"] + p["bc"]


if __name__ == "__main__":
    key = jax.random.PRNGKey(0)
    B = 8
    x = jax.random.normal(key, (B, 53), dtype=jnp.float32)

    params = make_params(seed=0)
    kparams = pack_kernel_params(params)

    actor_out, critic_out = gnn_forward(x, kparams)
    jax.block_until_ready((actor_out, critic_out))

    ref_actor, ref_critic = gnn_forward_ref(x, params)
    # bf16 matmul operands + bf16 output with f32 accumulation -> ~1e-2 error
    np.testing.assert_allclose(np.asarray(actor_out), np.asarray(ref_actor),
                               rtol=5e-2, atol=5e-2)
    np.testing.assert_allclose(np.asarray(critic_out), np.asarray(ref_critic),
                               rtol=5e-2, atol=5e-2)

    assert actor_out.shape == (B, 78)
    assert critic_out.shape == (B, 1)
    print("KERNEL_OK")
</pallas_src>

<mosaic_0001>
module attributes {stable_mosaic.version = 11 : i64} {
  func.func @gnn_kernel(%arg0: i32, %arg1: memref<8x53xf32, #tpu.memory_space<vmem>>, %arg2: memref<64x128xbf16, #tpu.memory_space<vmem>>, %arg3: memref<1x128xf32, #tpu.memory_space<vmem>>, %arg4: memref<128x128xbf16, #tpu.memory_space<vmem>>, %arg5: memref<1x128xf32, #tpu.memory_space<vmem>>, %arg6: memref<128x256xbf16, #tpu.memory_space<vmem>>, %arg7: memref<1x256xf32, #tpu.memory_space<vmem>>, %arg8: memref<256x128xbf16, #tpu.memory_space<vmem>>, %arg9: memref<1x128xf32, #tpu.memory_space<vmem>>, %arg10: memref<8x128xbf16, #tpu.memory_space<vmem>>, %arg11: memref<8x64xf32, #tpu.memory_space<vmem>>) attributes {dimension_semantics = [#tpu.dimension_semantics<parallel>], iteration_bounds = array<i64: 1>, scalar_prefetch = 0 : i64, scratch_operands = 1 : i64, tpu.core_type = #tpu.core_type<tc>, window_params = [{transform_indices = @transform_0, window_bounds = array<i64: 8, 53>}, {pipeline_mode = #tpu.pipeline_mode<synchronous>, transform_indices = @transform_1, window_bounds = array<i64: 64, 128>}, {pipeline_mode = #tpu.pipeline_mode<synchronous>, transform_indices = @transform_2, window_bounds = array<i64: 1, 128>}, {pipeline_mode = #tpu.pipeline_mode<synchronous>, transform_indices = @transform_3, window_bounds = array<i64: 128, 128>}, {pipeline_mode = #tpu.pipeline_mode<synchronous>, transform_indices = @transform_4, window_bounds = array<i64: 1, 128>}, {pipeline_mode = #tpu.pipeline_mode<synchronous>, transform_indices = @transform_5, window_bounds = array<i64: 128, 256>}, {pipeline_mode = #tpu.pipeline_mode<synchronous>, transform_indices = @transform_6, window_bounds = array<i64: 1, 256>}, {pipeline_mode = #tpu.pipeline_mode<synchronous>, transform_indices = @transform_7, window_bounds = array<i64: 256, 128>}, {pipeline_mode = #tpu.pipeline_mode<synchronous>, transform_indices = @transform_8, window_bounds = array<i64: 1, 128>}, {transform_indices = @transform_9, window_bounds = array<i64: 8, 128>}]} {
    %cst = arith.constant 0.000000e+00 : f32
    %0 = vector.broadcast %cst : f32 to vector<8x64xf32>
    %c0 = arith.constant 0 : index
    %c0_0 = arith.constant 0 : index
    %1 = vector.load %arg11[%c0, %c0_0] : memref<8x64xf32, #tpu.memory_space<vmem>>, vector<8x64xf32>
    tpu.vector_store %arg11[%c0, %c0_0], %0 {strides = array<i32>} : memref<8x64xf32, #tpu.memory_space<vmem>>, vector<8x64xf32>,
    %c0_1 = arith.constant 0 : index
    %c0_2 = arith.constant 0 : index
    %2 = vector.load %arg1[%c0_1, %c0_2] : memref<8x53xf32, #tpu.memory_space<vmem>>, vector<8x53xf32>
    %c0_3 = arith.constant 0 : index
    %c0_4 = arith.constant 0 : index
    %3 = vector.load %arg11[%c0_3, %c0_4] : memref<8x64xf32, #tpu.memory_space<vmem>>, vector<8x53xf32>
    tpu.vector_store %arg11[%c0_3, %c0_4], %2 {strides = array<i32>} : memref<8x64xf32, #tpu.memory_space<vmem>>, vector<8x53xf32>,
    %c0_5 = arith.constant 0 : index
    %c0_6 = arith.constant 0 : index
    %4 = vector.load %arg11[%c0_5, %c0_6] : memref<8x64xf32, #tpu.memory_space<vmem>>, vector<8x64xf32>
    %5 = arith.truncf %4 : vector<8x64xf32> to vector<8x64xbf16>
    %c0_7 = arith.constant 0 : index
    %c0_8 = arith.constant 0 : index
    %6 = vector.load %arg2[%c0_7, %c0_8] : memref<64x128xbf16, #tpu.memory_space<vmem>>, vector<64x128xbf16>
    %cst_9 = arith.constant dense<0.000000e+00> : vector<8x128xf32>
    %7 = tpu.matmul %5, %6, %cst_9 {dimension_numbers = #tpu.dot_dimension_numbers<[1], [0], [0], [1], [0, 0, 1, 1], [], []>} : vector<8x64xbf16>, vector<64x128xbf16>, vector<8x128xf32> -> vector<8x128xf32>
    %c0_10 = arith.constant 0 : index
    %c0_11 = arith.constant 0 : index
    %8 = vector.load %arg3[%c0_10, %c0_11] : memref<1x128xf32, #tpu.memory_space<vmem>>, vector<1x128xf32>
    %9 = vector.broadcast %8 : vector<1x128xf32> to vector<8x128xf32>
    %10 = arith.addf %7, %9 : vector<8x128xf32>
    %cst_12 = arith.constant 0.000000e+00 : f32
    %11 = vector.broadcast %cst_12 : f32 to vector<8x128xf32>
    %12 = arith.maximumf %10, %11 : vector<8x128xf32>
    %13 = arith.truncf %12 : vector<8x128xf32> to vector<8x128xbf16>
    %c0_13 = arith.constant 0 : index
    %c0_14 = arith.constant 0 : index
    %14 = vector.load %arg4[%c0_13, %c0_14] : memref<128x128xbf16, #tpu.memory_space<vmem>>, vector<128x128xbf16>
    %cst_15 = arith.constant dense<0.000000e+00> : vector<8x128xf32>
    %15 = tpu.matmul %13, %14, %cst_15 {dimension_numbers = #tpu.dot_dimension_numbers<[1], [0], [0], [1], [0, 0, 1, 1], [], []>} : vector<8x128xbf16>, vector<128x128xbf16>, vector<8x128xf32> -> vector<8x128xf32>
    %c0_16 = arith.constant 0 : index
    %c0_17 = arith.constant 0 : index
    %16 = vector.load %arg5[%c0_16, %c0_17] : memref<1x128xf32, #tpu.memory_space<vmem>>, vector<1x128xf32>
    %17 = vector.broadcast %16 : vector<1x128xf32> to vector<8x128xf32>
    %18 = arith.addf %15, %17 : vector<8x128xf32>
    %cst_18 = arith.constant 0.000000e+00 : f32
    %19 = vector.broadcast %cst_18 : f32 to vector<8x128xf32>
    %20 = arith.maximumf %18, %19 : vector<8x128xf32>
    %21 = arith.truncf %20 : vector<8x128xf32> to vector<8x128xbf16>
    %c0_19 = arith.constant 0 : index
    %c0_20 = arith.constant 0 : index
    %22 = vector.load %arg6[%c0_19, %c0_20] : memref<128x256xbf16, #tpu.memory_space<vmem>>, vector<128x256xbf16>
    %cst_21 = arith.constant dense<0.000000e+00> : vector<8x256xf32>
    %23 = tpu.matmul %21, %22, %cst_21 {dimension_numbers = #tpu.dot_dimension_numbers<[1], [0], [0], [1], [0, 0, 1, 1], [], []>} : vector<8x128xbf16>, vector<128x256xbf16>, vector<8x256xf32> -> vector<8x256xf32>
    %c0_22 = arith.constant 0 : index
    %c0_23 = arith.constant 0 : index
    %24 = vector.load %arg7[%c0_22, %c0_23] : memref<1x256xf32, #tpu.memory_space<vmem>>, vector<1x256xf32>
    %25 = vector.broadcast %24 : vector<1x256xf32> to vector<8x256xf32>
    %26 = arith.addf %23, %25 : vector<8x256xf32>
    %cst_24 = arith.constant 0.000000e+00 : f32
    %27 = vector.broadcast %cst_24 : f32 to vector<8x256xf32>
    %28 = arith.maximumf %26, %27 : vector<8x256xf32>
    %29 = arith.truncf %28 : vector<8x256xf32> to vector<8x256xbf16>
    %c0_25 = arith.constant 0 : index
    %c0_26 = arith.constant 0 : index
    %30 = vector.load %arg8[%c0_25, %c0_26] : memref<256x128xbf16, #tpu.memory_space<vmem>>, vector<256x128xbf16>
    %cst_27 = arith.constant dense<0.000000e+00> : vector<8x128xf32>
    %31 = tpu.matmul %29, %30, %cst_27 {dimension_numbers = #tpu.dot_dimension_numbers<[1], [0], [0], [1], [0, 0, 1, 1], [], []>} : vector<8x256xbf16>, vector<256x128xbf16>, vector<8x128xf32> -> vector<8x128xf32>
    %c0_28 = arith.constant 0 : index
    %c0_29 = arith.constant 0 : index
    %32 = vector.load %arg9[%c0_28, %c0_29] : memref<1x128xf32, #tpu.memory_space<vmem>>, vector<1x128xf32>
    %33 = vector.broadcast %32 : vector<1x128xf32> to vector<8x128xf32>
    %34 = arith.addf %31, %33 : vector<8x128xf32>
    %35 = arith.truncf %34 : vector<8x128xf32> to vector<8x128xbf16>
    %c0_30 = arith.constant 0 : index
    %c0_31 = arith.constant 0 : index
    %36 = vector.load %arg10[%c0_30, %c0_31] : memref<8x128xbf16, #tpu.memory_space<vmem>>, vector<8x128xbf16>
    tpu.vector_store %arg10[%c0_30, %c0_31], %35 {strides = array<i32>} : memref<8x128xbf16, #tpu.memory_space<vmem>>, vector<8x128xbf16>,
    return
  }
  func.func @transform_0(%arg0: i32) -> (i32, i32) {
    %c0_i32 = arith.constant 0 : i32
    %c0_i32_0 = arith.constant 0 : i32
    return %arg0, %c0_i32 : i32, i32
  }
  func.func @transform_1(%arg0: i32) -> (i32, i32) {
    %c0_i32 = arith.constant 0 : i32
    %c0_i32_0 = arith.constant 0 : i32
    %c0_i32_1 = arith.constant 0 : i32
    return %c0_i32, %c0_i32_0 : i32, i32
  }
  func.func @transform_2(%arg0: i32) -> (i32, i32) {
    %c0_i32 = arith.constant 0 : i32
    %c0_i32_0 = arith.constant 0 : i32
    %c0_i32_1 = arith.constant 0 : i32
    return %c0_i32, %c0_i32_0 : i32, i32
  }
  func.func @transform_3(%arg0: i32) -> (i32, i32) {
    %c0_i32 = arith.constant 0 : i32
    %c0_i32_0 = arith.constant 0 : i32
    %c0_i32_1 = arith.constant 0 : i32
    return %c0_i32, %c0_i32_0 : i32, i32
  }
  func.func @transform_4(%arg0: i32) -> (i32, i32) {
    %c0_i32 = arith.constant 0 : i32
    %c0_i32_0 = arith.constant 0 : i32
    %c0_i32_1 = arith.constant 0 : i32
    return %c0_i32, %c0_i32_0 : i32, i32
  }
  func.func @transform_5(%arg0: i32) -> (i32, i32) {
    %c0_i32 = arith.constant 0 : i32
    %c0_i32_0 = arith.constant 0 : i32
    %c0_i32_1 = arith.constant 0 : i32
    return %c0_i32, %c0_i32_0 : i32, i32
  }
  func.func @transform_6(%arg0: i32) -> (i32, i32) {
    %c0_i32 = arith.constant 0 : i32
    %c0_i32_0 = arith.constant 0 : i32
    %c0_i32_1 = arith.constant 0 : i32
    return %c0_i32, %c0_i32_0 : i32, i32
  }
  func.func @transform_7(%arg0: i32) -> (i32, i32) {
    %c0_i32 = arith.constant 0 : i32
    %c0_i32_0 = arith.constant 0 : i32
    %c0_i32_1 = arith.constant 0 : i32
    return %c0_i32, %c0_i32_0 : i32, i32
  }
  func.func @transform_8(%arg0: i32) -> (i32, i32) {
    %c0_i32 = arith.constant 0 : i32
    %c0_i32_0 = arith.constant 0 : i32
    %c0_i32_1 = arith.constant 0 : i32
    return %c0_i32, %c0_i32_0 : i32, i32
  }
  func.func @transform_9(%arg0: i32) -> (i32, i32) {
    %c0_i32 = arith.constant 0 : i32
    %c0_i32_0 = arith.constant 0 : i32
    return %arg0, %c0_i32 : i32, i32
  }
}

</mosaic_0001>

<bundles_post_ra>
// kernel: tpu_custom_call.1
= control target key start
LH: loop header
LB: loop body
LE: loop exit
PB: predicated region body
PF: predicated region fallthrough
CT: control target
= control target key end

     0   :  { %14 = vsyncpa [#allocation4], 0  ;;  %s1064_s0 = inlined_call_operand.hbm [shape: f32[8,53], index: 0, kind: input, shape index: {}]   ;;  %s1065_s1 = inlined_call_operand.hbm [shape: bf16[64,128], index: 1, kind: input, shape index: {}]   ;;  %s1066_s2 = inlined_call_operand.vmem [shape: f32[1,128], index: 2, kind: input, shape index: {}]   ;;  %s1067_s3 = inlined_call_operand.hbm [shape: bf16[128,128], index: 3, kind: input, shape index: {}]   ;;  %s1068_s4 = inlined_call_operand.vmem [shape: f32[1,128], index: 4, kind: input, shape index: {}]   ;;  %s1069_s5 = inlined_call_operand.hbm [shape: bf16[128,256], index: 5, kind: input, shape index: {}]   ;;  %s1070_s6 = inlined_call_operand.vmem [shape: f32[1,256], index: 6, kind: input, shape index: {}]   ;;  %s1071_s7 = inlined_call_operand.hbm [shape: bf16[256,128], index: 7, kind: input, shape index: {}]   ;;  %s1072_s8 = inlined_call_operand.vmem [shape: f32[1,128], index: 8, kind: input, shape index: {}]   ;;  %s1073_s9 = inlined_call_operand.hbm [shape: bf16[8,128], index: 9, kind: output, shape index: {}]  }
   0x1   :  { %15 = vsyncpa [#allocation7], 0 }
   0x2   :  { %16 = vsyncpa [#allocation10], 0 }
   0x3   :  { %17 = vsyncpa [#allocation5], 0  ;;  %s960_s30 = smov [#allocation6]  }
   0x4   :  { %s33_s10 = sshll.u32 %s960_s30, 4  ;;  %s34_s10 = int_to_ptr.vmem [resolvable:$true] %s33_s10 }
   0x5   :  { %s840_s11 = scalar_lea.vmem %s34_s10, 512  ;;  %p845_p1 = scmp.lt.s32.totalorder %s34_s10, %s34_s10 }
   0x6   :  { %p841_p0 = scmp.ne.s32.totalorder %s34_s10, %s840_s11  ;;  %p846_p2 = scmp.lt.s32.totalorder %s840_s11, %s840_s11 }
   0x8   :  { %p847_p3 = por %p846_p2, %p845_p1 }
   0xa   :  { %p848_p4 = pnand %p847_p3, %p841_p0 }
   0xc   :  { %851 = shalt.err (!%p848_p4)
}
   0xd   :  { %s961_s12 = smov 64   ;;  %s962_s13 = smov 4  }
   0xe   :  { %39 = dma.hbm_to_vmem [thread:$0]  %s1065_s1, 512, %s34_s10, [#allocation7], %s961_s12, %s961_s12, %s962_s13  }
   0xf   :  { %s963_s16 = smov [#allocation9]  }
  0x10   :  { %s61_s17 = sshll.u32 %s963_s16, 4  ;;  %s62_s17 = int_to_ptr.vmem [resolvable:$true] %s61_s17 }
  0x11   :  { %s860_s18 = scalar_lea.vmem %s62_s17, 2048  ;;  %p865_p6 = scmp.lt.s32.totalorder %s62_s17, %s62_s17 }
  0x12   :  { %p861_p5 = scmp.ne.s32.totalorder %s62_s17, %s860_s18  ;;  %p866_p7 = scmp.lt.s32.totalorder %s860_s18, %s860_s18 }
  0x14   :  { %p867_p8 = por %p866_p7, %p865_p6 }
  0x16   :  { %p868_p9 = pnand %p867_p8, %p861_p5 }
  0x18   :  { %871 = shalt.err (!%p868_p9)
}
  0x19   :  { %s964_s19 = smov 128   ;;  %s965_s20 = smov 8  }
  0x1a   :  { %67 = dma.hbm_to_vmem [thread:$0]  %s1069_s5, 2048, %s62_s17, [#allocation10], %s964_s19, %s964_s19, %s965_s20  }
  0x1b   :  { %s966_s23 = smov [#allocation3]   ;;  %s967_s25 = smov [#allocation8]  }
  0x1c   :  { %s24_s24 = sshll.u32 %s966_s23, 4  ;;  %s47_s1 = sshll.u32 %s967_s25, 4  ;;  %s25_s24 = int_to_ptr.vmem [resolvable:$true] %s24_s24  ;;  %s48_s1 = int_to_ptr.vmem [resolvable:$true] %s47_s1 }
  0x1d   :  { %s880_s26 = scalar_lea.vmem %s25_s24, 128  ;;  %p885_p11 = scmp.lt.s32.totalorder %s25_s24, %s25_s24 }
  0x1e   :  { %p881_p10 = scmp.ne.s32.totalorder %s25_s24, %s880_s26  ;;  %p886_p12 = scmp.lt.s32.totalorder %s880_s26, %s880_s26 }
  0x20   :  { %p887_p13 = por %p886_p12, %p885_p11 }
  0x22   :  { %p888_p0 = pnand %p887_p13, %p881_p10 }
  0x24   :  { %891 = shalt.err (!%p888_p0)
}
  0x25   :  { %27 = dma.hbm_to_vmem [thread:$0]  %s1064_s0, 128, %s25_s24, [#allocation4]  }
  0x26   :  { %s900_s29 = scalar_lea.vmem %s48_s1, 1024  ;;  %p905_p2 = scmp.lt.s32.totalorder %s48_s1, %s48_s1 }
  0x27   :  { %p901_p1 = scmp.ne.s32.totalorder %s48_s1, %s900_s29  ;;  %p906_p3 = scmp.lt.s32.totalorder %s900_s29, %s900_s29 }
  0x29   :  { %p907_p4 = por %p906_p3, %p905_p2 }
  0x2b   :  { %p908_p5 = pnand %p907_p4, %p901_p1 }
  0x2d   :  { %911 = shalt.err (!%p908_p5)
}
  0x2e   :  { %53 = dma.hbm_to_vmem [thread:$0]  %s1067_s3, 1024, %s48_s1, [#allocation7], %s961_s12, %s961_s12, %s962_s13  }
  0x2f   :  { %s968_s10 = smov [#allocation11]  }
  0x30   :  { %s75_s11 = sshll.u32 %s968_s10, 4  ;;  %s76_s11 = int_to_ptr.vmem [resolvable:$true] %s75_s11 }
  0x31   :  { %s920_s14 = scalar_lea.vmem %s76_s11, 2048  ;;  %p925_p7 = scmp.lt.s32.totalorder %s76_s11, %s76_s11 }
  0x32   :  { %p921_p6 = scmp.ne.s32.totalorder %s76_s11, %s920_s14  ;;  %p926_p8 = scmp.lt.s32.totalorder %s920_s14, %s920_s14 }
  0x34   :  { %p927_p9 = por %p926_p8, %p925_p7 }
  0x36   :  { %p928_p10 = pnand %p927_p9, %p921_p6 }
  0x38   :  { %931 = shalt.err (!%p928_p10)
}
  0x39   :  { %81 = dma.hbm_to_vmem [thread:$0]  %s1071_s7, 2048, %s76_s11, [#allocation10], %s961_s12, %s961_s12, %s962_s13  }
  0x3a   :  { %952 = dma.done.wait [#allocation4], 128  }
  0x3b   :  { %953 = vsyncadd [#allocation4], 4294967168 }
  0x3c   :  { %954 = dma.done.wait [#allocation7], 1536  }
  0x3d   :  { %955 = vsyncadd [#allocation7], 4294965760 }
  0x3e   :  { %956 = dma.done.wait [#allocation10], 4096  }
  0x3f   :  { %957 = vsyncadd [#allocation10], 4294963200  ;;  %vm100_vm0 = vcmask 523264   ;;  %v969_v0 = vmov 0.0   ;;  %vm970_vm1 = vmmov 0   ;;  %v780_v1 = vld [vmem:[#allocation6 + $0x18] sm:$0xff]  }
  0x40   :  { %735 = vmatprep.subr.bf16.mxu0 %v969_v0  ;;  %743 = vmatprep.mubr.msk.bf16.mxu0 %vm970_vm1, %v969_v0  ;;  %101 = vst.msk [vmem:[#allocation2] sm:$0xff] %vm100_vm0, %v969_v0  ;;  %v781_v2 = vld [vmem:[#allocation6 + $0x10] sm:$0xff]   ;;  %vm103_vm2 = vcmask 433152   ;;  %v102_v3 = vld [vmem:[#allocation3] sm:$0xff]  ;;  %v782_v5 = vld [vmem:[#allocation6 + $0x8] sm:$0xff]   ;;  %v971_v40 = vmov 0  }
  0x41   :  { %747 = vmatprep.subr.bf16.mxu1 %v969_v0  ;;  %763 = vmatprep.mubr.msk.bf16.mxu1 %vm970_vm1, %v969_v0  ;;  %104 = vst.msk [vmem:[#allocation2] sm:$0xff] %vm103_vm2, %v102_v3  ;;  %v784_v4 = vld [vmem:[#allocation8 + $0x38] sm:$0xff]   ;;  %v785_v6 = vld [vmem:[#allocation8 + $0x30] sm:$0xff]   ;;  %v783_v7 = vld [vmem:[#allocation6] sm:$0xff]  }
  0x42   :  { %736 = vmatpush3.bf16.msra.mxu0 %v780_v1  ;;  %748 = vmatpush3.bf16.msra.mxu1 %v784_v4  ;;  %v786_v8 = vld [vmem:[#allocation8 + $0x28] sm:$0xff]   ;;  %v787_v11 = vld [vmem:[#allocation8 + $0x20] sm:$0xff]   ;;  %v788_v12 = vld [vmem:[#allocation8 + $0x18] sm:$0xff]   ;;  %v322_v1 = vlaneseq }
  0x43   :  { %737 = vmatprep.subr.bf16.mxu0 %v969_v0  ;;  %749 = vmatprep.subr.bf16.mxu1 %v969_v0  ;;  %v789_v13 = vld [vmem:[#allocation8 + $0x10] sm:$0xff]   ;;  %v790_v14 = vld [vmem:[#allocation8 + $0x8] sm:$0xff]   ;;  %v791_v15 = vld [vmem:[#allocation8] sm:$0xff]  }
  0x44   :  { %v792_v16 = vld [vmem:[#allocation9 + $0x70] ss:$8 sps:$4 sm:$0xff]   ;;  %v794_v17 = vld [vmem:[#allocation9 + $0x74] ss:$8 sps:$4 sm:$0xff]   ;;  %v797_v18 = vld [vmem:[#allocation9 + $0x64] ss:$8 sps:$4 sm:$0xff]  }
  0x45   :  { %v795_v19 = vld [vmem:[#allocation9 + $0x60] ss:$8 sps:$4 sm:$0xff]   ;;  %v800_v20 = vld [vmem:[#allocation9 + $0x54] ss:$8 sps:$4 sm:$0xff]   ;;  %v798_v21 = vld [vmem:[#allocation9 + $0x50] ss:$8 sps:$4 sm:$0xff]  }
  0x46   :  { %738 = vmatpush3.bf16.msra.mxu0 %v781_v2  ;;  %750 = vmatpush3.bf16.msra.mxu1 %v785_v6  ;;  %v803_v22 = vld [vmem:[#allocation9 + $0x44] ss:$8 sps:$4 sm:$0xff]   ;;  %v801_v23 = vld [vmem:[#allocation9 + $0x40] ss:$8 sps:$4 sm:$0xff]   ;;  %v806_v24 = vld [vmem:[#allocation9 + $0x34] ss:$8 sps:$4 sm:$0xff]  }
  0x47   :  { %739 = vmatprep.subr.bf16.mxu0 %v969_v0  ;;  %751 = vmatprep.subr.bf16.mxu1 %v969_v0  ;;  %v804_v25 = vld [vmem:[#allocation9 + $0x30] ss:$8 sps:$4 sm:$0xff]   ;;  %v809_v26 = vld [vmem:[#allocation9 + $0x24] ss:$8 sps:$4 sm:$0xff]   ;;  %v807_v27 = vld [vmem:[#allocation9 + $0x20] ss:$8 sps:$4 sm:$0xff]  }
  0x48   :  { %v105_v9 = vld [vmem:[#allocation2] sm:$0xff]  ;;  %v815_v38 = vld [vmem:[#allocation9 + $0x4] ss:$8 sps:$4 sm:$0xff]   ;;  %v813_v39 = vld [vmem:[#allocation9] ss:$8 sps:$4 sm:$0xff]   ;;  %v323_v2 = vshrl.u32 %v322_v1, 7 }
  0x49   :  { %v106_v10 = vpack.c.bf16 %v105_v9, %v105_v9  ;;  %v812_v28 = vld [vmem:[#allocation9 + $0x14] ss:$8 sps:$4 sm:$0xff]   ;;  %v810_v29 = vld [vmem:[#allocation9 + $0x10] ss:$8 sps:$4 sm:$0xff]   ;;  %v820_v45 = vld [vmem:[#allocation11 + $0x68] sm:$0xff]  }
  0x4a   :  { %740 = vmatpush3.bf16.msra.mxu0 %v782_v5  ;;  %752 = vmatpush3.bf16.msra.mxu1 %v786_v8  ;;  %v651_v30 = vld [vmem:[%s1066_s2] ss:$0 sm:$0xff]  ;;  %v816_v41 = vld [vmem:[#allocation11 + $0x78] sm:$0xff]   ;;  %v821_v46 = vld [vmem:[#allocation11 + $0x28] sm:$0xff]   ;;  %v324_v3 = vsub.s32 0, %v323_v2  ;;  %v328_v5 = vsub.s32 1, %v323_v2 }
  0x4b   :  { %741 = vmatprep.subr.bf16.mxu0 %v969_v0  ;;  %753 = vmatprep.subr.bf16.mxu1 %v969_v0  ;;  %v817_v42 = vld [vmem:[#allocation11 + $0x38] sm:$0xff]   ;;  %v818_v43 = vld [vmem:[#allocation11 + $0x70] sm:$0xff]   ;;  %v822_v47 = vld [vmem:[#allocation11 + $0x60] sm:$0xff]  }
  0x4c   :  { %v819_v44 = vld [vmem:[#allocation11 + $0x30] sm:$0xff]   ;;  %v823_v48 = vld [vmem:[#allocation11 + $0x20] sm:$0xff]   ;;  %v824_v49 = vld [vmem:[#allocation11 + $0x58] sm:$0xff]  }
  0x4d   :  { %v825_v50 = vld [vmem:[#allocation11 + $0x18] sm:$0xff]   ;;  %v826_v51 = vld [vmem:[#allocation11 + $0x50] sm:$0xff]   ;;  %v828_v61 = vld [vmem:[#allocation11 + $0x48] sm:$0xff]  }
  0x4e   :  { %742 = vmatpush3.bf16.msra.mxu0 %v783_v7  ;;  %754 = vmatpush3.bf16.msra.mxu1 %v787_v11  ;;  %v827_v52 = vld [vmem:[#allocation11 + $0x10] sm:$0xff]   ;;  %v829_v62 = vld [vmem:[#allocation11 + $0x8] sm:$0xff]   ;;  %v830_v63 = vld [vmem:[#allocation11 + $0x40] sm:$0xff]  }
  0x4f   :  { %755 = vmatprep.subr.bf16.mxu1 %v969_v0  ;;  %412 = vmatprep.subr.bf16.mxu0 %v794_v17  ;;  %v657_v53 = vld [vmem:[%s1068_s4] ss:$0 sm:$0xff] }
  0x50   :  { %v320_v4 = vld [vmem:[%s1070_s6] sm:$0x3]  ;;  %s972_s6 = smov [#allocation12]  }
  0x51   :  { %744 = vmatmul.mubr.msk.bf16.vlgmr.msra.gmra.mxu0 %vm100_vm0, %v106_v10  ;;  %v325_v6 = vrot.slane %v320_v4, %v324_v3  ;;  %v329_v7 = vrot.slane %v320_v4, %v328_v5  ;;  %s640_s18 = sshll.u32 %s972_s6, 4  ;;  %s641_s18 = int_to_ptr.vmem [resolvable:$true] %s640_s18 }
  0x52   :  { %756 = vmatpush3.bf16.msra.mxu1 %v788_v12  ;;  %413 = vmatpush1.bf16.msra.mxu0 %v792_v16  ;;  %s932_s19 = scalar_lea.vmem %s641_s18, 64  ;;  %p937_p12 = scmp.lt.s32.totalorder %s641_s18, %s641_s18 }
  0x53   :  { %757 = vmatprep.subr.bf16.mxu1 %v969_v0  ;;  %414 = vmatprep.subr.bf16.mxu0 %v797_v18  ;;  %p933_p11 = scmp.ne.s32.totalorder %s641_s18, %s932_s19  ;;  %p938_p13 = scmp.lt.s32.totalorder %s932_s19, %s932_s19 }
  0x54   :  { %444 = vmatprep.mubr.bf16.mxu0 %v971_v40 }
  0x55   :  { %p939_p0 = por %p938_p13, %p937_p12 }
  0x56   :  { %758 = vmatpush3.bf16.msra.mxu1 %v789_v13  ;;  %415 = vmatpush1.bf16.msra.mxu0 %v795_v19  ;;  %v682_v19 = vld [vmem:[%s1072_s8] ss:$0 sm:$0xff] }
  0x57   :  { %759 = vmatprep.subr.bf16.mxu1 %v969_v0  ;;  %416 = vmatprep.subr.bf16.mxu0 %v800_v20  ;;  %p940_p1 = pnand %p939_p0, %p933_p11 }
  0x5a   :  { %760 = vmatpush3.bf16.msra.mxu1 %v790_v14  ;;  %417 = vmatpush1.bf16.msra.mxu0 %v798_v21 }
  0x5b   :  { %761 = vmatprep.subr.bf16.mxu1 %v969_v0  ;;  %418 = vmatprep.subr.bf16.mxu0 %v803_v22  ;;  %v831_v0 = vld [vmem:[#allocation11] sm:$0xff]  }
  0x5e   :  { %762 = vmatpush3.bf16.msra.mxu1 %v791_v15  ;;  %419 = vmatpush1.bf16.msra.mxu0 %v801_v23 }
  0x5f   :  { %420 = vmatprep.subr.bf16.mxu0 %v806_v24  ;;  %713 = vmatprep.subr.bf16.mxu1 %v816_v41 }
  0x62   :  { %421 = vmatpush1.bf16.msra.mxu0 %v804_v25 }
  0x63   :  { %422 = vmatprep.subr.bf16.mxu0 %v809_v26 }
  0x66   :  { %423 = vmatpush1.bf16.msra.mxu0 %v807_v27 }
  0x67   :  { %424 = vmatprep.subr.bf16.mxu0 %v812_v28 }
  0x6a   :  { %425 = vmatpush1.bf16.msra.mxu0 %v810_v29 }
  0x6b   :  { %426 = vmatprep.subr.bf16.mxu0 %v815_v38 }
  0x6e   :  { %427 = vmatpush1.bf16.msra.mxu0 %v813_v39 }
 0x111   :  { %v183_v31 = vpop.f32.mrf.mxu0 }
 0x112   :  { %v184_v32 = vadd.f32 %v651_v30, %v183_v31 }
 0x113   :  { %v745_v33 = vpop.f32.mrf.mxu0 }
 0x114   :  { %v189_v34 = vmax.f32 %v184_v32, 0.0 }
 0x115   :  { %v186_v35 = vpop.f32.mrf.mxu0 }
 0x116   :  { %v190_v36 = vpack.c.bf16 %v189_v34, %v189_v34 }
 0x117   :  { %v746_v37 = vpop.f32.mrf.mxu0 }
 0x118   :  { %764 = vmatmul.mubr.bf16.vlgmr.msra.gmra.mxu1 %v190_v36 }
 0x119   :  { %714 = vmatpush3.bf16.msra.mxu1 %v817_v42 }
 0x11a   :  { %715 = vmatprep.subr.bf16.mxu1 %v818_v43 }
 0x11d   :  { %716 = vmatpush3.bf16.msra.mxu1 %v819_v44 }
 0x11e   :  { %717 = vmatprep.subr.bf16.mxu1 %v820_v45 }
 0x121   :  { %718 = vmatpush3.bf16.msra.mxu1 %v821_v46 }
 0x122   :  { %719 = vmatprep.subr.bf16.mxu1 %v822_v47 }
 0x125   :  { %720 = vmatpush3.bf16.msra.mxu1 %v823_v48 }
 0x126   :  { %721 = vmatprep.subr.bf16.mxu1 %v824_v49 }
 0x129   :  { %722 = vmatpush3.bf16.msra.mxu1 %v825_v50 }
 0x12a   :  { %723 = vmatprep.subr.bf16.mxu1 %v826_v51 }
 0x12d   :  { %724 = vmatpush3.bf16.msra.mxu1 %v827_v52 }
 0x12e   :  { %725 = vmatprep.subr.bf16.mxu1 %v828_v61 }
 0x131   :  { %726 = vmatpush3.bf16.msra.mxu1 %v829_v62 }
 0x132   :  { %727 = vmatprep.subr.bf16.mxu1 %v830_v63 }
 0x135   :  { %728 = vmatpush3.bf16.msra.mxu1 %v831_v0 }
 0x1d8   :  { %v296_v54 = vpop.f32.mrf.mxu1 }
 0x1d9   :  { %v297_v55 = vadd.f32 %v657_v53, %v296_v54 }
 0x1da   :  { %v765_v56 = vpop.f32.mrf.mxu1 }
 0x1db   :  { %v302_v57 = vmax.f32 %v297_v55, 0.0 }
 0x1dc   :  { %v299_v58 = vpop.f32.mrf.mxu1 }
 0x1dd   :  { %v303_v59 = vpack.c.bf16 %v302_v57, %v302_v57 }
 0x1de   :  { %v766_v60 = vpop.f32.mrf.mxu1 }
 0x1df   :  { %445 = vmatmul.mubr.bf16.vlgmr.msra.gmra.mxu0 %v303_v59 }
 0x29f   :  { %v446_v8 = vpop.f32.mrf.mxu0 }
 0x2a0   :  { %v447_v9 = vadd.f32 %v446_v8, %v325_v6 }
 0x2a1   :  { %v448_v10 = vpop.f32.mrf.mxu0 }
 0x2a2   :  { %v449_v11 = vadd.f32 %v448_v10, %v329_v7  ;;  %v453_v12 = vmax.f32 %v447_v9, 0.0 }
 0x2a3   :  { %v450_v13 = vpop.f32.mrf.mxu0 }
 0x2a4   :  { %v454_v14 = vmax.f32 %v449_v11, 0.0  ;;  %v455_v17 = vpack.c.bf16 %v453_v12, %v453_v12 }
 0x2a5   :  { %v451_v15 = vpop.f32.mrf.mxu0 }
 0x2a6   :  { %v456_v16 = vpack.c.bf16 %v454_v14, %v454_v14 }
 0x2a8   :  { %624 = vmatprep.mubr.bf16.mxu1 %v456_v16 }
 0x2a9   :  { %625 = vmatmul.mubr.bf16.vlgmr.msra.gmra.mxu1 %v455_v17 }
 0x369   :  { %v729_v18 = vpop.f32.mrf.mxu1 }
 0x36b   :  { %v730_v20 = vpop.f32.mrf.mxu1 }
 0x36c   :  { %v731_v21 = vadd.f32 %v730_v20, %v729_v18 }
 0x36d   :  { %v732_v22 = vpop.f32.mrf.mxu1 }
 0x36e   :  { %v627_v23 = vadd.f32 %v731_v21, %v682_v19 }
 0x36f   :  { %v733_v24 = vpop.f32.mrf.mxu1 }
 0x370   :  { %v632_v25 = vpack.c.bf16 %v627_v23, %v627_v23 }
 0x372   :  { %633 = vst [vmem:[#allocation12] sm:$0xf] %v632_v25 }
 0x373   :  { %943 = shalt.err (!%p940_p1)
}
 0x374   :  { %643 = dma.vmem_to_hbm [thread:$0]  %s641_s18, 64, %s1073_s9, [#allocation5]  }
 0x375   :  { %958 = dma.done.wait [#allocation5], 64  }
 0x376   :  { %959 = vsyncadd [#allocation5], 4294967232 }
 0x377   :  { %647 = vsyncpa [#allocation4], 1 }
 0x378   :  { %648 = vsyncpa [#allocation7], 1 }
 0x379   :  { %649 = vsyncpa [#allocation10], 1 }
 0x37a   :  { %650 = vsyncpa [#allocation5], 1 }

</bundles_post_ra>
